<compile_context>
chip_gen: v7x
topology: tpu7x:2x2x1
jax: 0.10.0
libtpu: 0.0.40
codegen_flags: <defaults>
</compile_context>

<pallas_src>
import functools

import jax
import jax.numpy as jnp
from jax.experimental import pallas as pl
from jax.experimental.pallas import tpu as pltpu

_LANE = 128


def _round_up(x, m):
    return ((x + m - 1) // m) * m


def _vmem_limit(nbytes_est):
    # Headroom for compiler scratch; stay well under v7x's 64 MiB/TC.
    return int(min(max(nbytes_est + (4 << 20), 16 << 20), 48 << 20))


# ---------------------------------------------------------------------------
# Kernels
# ---------------------------------------------------------------------------

def _fused_layer_kernel(adj_ref, h_ref, w_ref, b_ref, o_ref, *, relu):
    """o_tile = [relu]((adj_tile @ h_full) @ W + b); bf16 MXU, f32 accumulate."""
    t = jnp.dot(adj_ref[...], h_ref[...], preferred_element_type=jnp.float32)
    out = jnp.dot(t.astype(jnp.bfloat16), w_ref[...],
                  preferred_element_type=jnp.float32)
    out = out + b_ref[...]          # f32 bias, broadcasts over node rows
    if relu:
        out = jnp.maximum(out, 0.0)  # f32 epilogue
    o_ref[...] = out.astype(o_ref.dtype)


def _project_kernel(h_ref, w_ref, o_ref):
    """o_tile = h_tile @ W (used when W-first association wins on MXU passes)."""
    o_ref[...] = jnp.dot(h_ref[...], w_ref[...],
                         preferred_element_type=jnp.float32).astype(o_ref.dtype)


def _propagate_kernel(adj_ref, hw_ref, b_ref, o_ref, *, relu):
    """o_tile = [relu](adj_tile @ hw_full + b)."""
    out = jnp.dot(adj_ref[...], hw_ref[...], preferred_element_type=jnp.float32)
    out = out + b_ref[...]
    if relu:
        out = jnp.maximum(out, 0.0)
    o_ref[...] = out.astype(o_ref.dtype)


# ---------------------------------------------------------------------------
# Per-layer wrappers
# ---------------------------------------------------------------------------

def _fused_layer_call(adj, h, w, b, *, relu, out_dtype, tm):
    n = adj.shape[0]
    f_in = h.shape[1]
    f_out = w.shape[1]
    out_bytes = jnp.dtype(out_dtype).itemsize
    est = (4 * tm * n                 # double-buffered bf16 adj tiles
           + 4 * n * f_in             # resident bf16 dense input
           + 4 * f_in * f_out         # weights
           + 8 * f_out                # bias
           + 2 * tm * f_out * out_bytes)
    cost = pl.CostEstimate(
        flops=2 * n * n * f_in + 2 * n * f_in * f_out,
        transcendentals=0,
        bytes_accessed=2 * n * n + 2 * n * f_in + 2 * f_in * f_out
        + 4 * f_out + out_bytes * n * f_out)
    return pl.pallas_call(
        functools.partial(_fused_layer_kernel, relu=relu),
        out_shape=jax.ShapeDtypeStruct((n, f_out), out_dtype),
        grid=(pl.cdiv(n, tm),),
        in_specs=[
            pl.BlockSpec((tm, n), lambda i: (i, 0)),       # adj row tile (pipelined)
            pl.BlockSpec((n, f_in), lambda i: (0, 0)),     # full dense input, loaded once
            pl.BlockSpec((f_in, f_out), lambda i: (0, 0)),  # weights
            pl.BlockSpec((1, f_out), lambda i: (0, 0)),     # bias row
        ],
        out_specs=pl.BlockSpec((tm, f_out), lambda i: (i, 0)),
        compiler_params=pltpu.CompilerParams(
            dimension_semantics=("parallel",),
            vmem_limit_bytes=_vmem_limit(est)),
        cost_estimate=cost,
    )(adj, h, w, b)


def _project_call(h, w, *, tm):
    n, f_in = h.shape
    f_out = w.shape[1]
    est = 4 * tm * f_in + 4 * f_in * f_out + 4 * tm * f_out
    cost = pl.CostEstimate(
        flops=2 * n * f_in * f_out, transcendentals=0,
        bytes_accessed=2 * n * f_in + 2 * f_in * f_out + 2 * n * f_out)
    return pl.pallas_call(
        _project_kernel,
        out_shape=jax.ShapeDtypeStruct((n, f_out), jnp.bfloat16),
        grid=(pl.cdiv(n, tm),),
        in_specs=[
            pl.BlockSpec((tm, f_in), lambda i: (i, 0)),
            pl.BlockSpec((f_in, f_out), lambda i: (0, 0)),
        ],
        out_specs=pl.BlockSpec((tm, f_out), lambda i: (i, 0)),
        compiler_params=pltpu.CompilerParams(
            dimension_semantics=("parallel",),
            vmem_limit_bytes=_vmem_limit(est)),
        cost_estimate=cost,
    )(h, w)


def _propagate_call(adj, hw, b, *, relu, out_dtype, tm):
    n = adj.shape[0]
    f_out = hw.shape[1]
    out_bytes = jnp.dtype(out_dtype).itemsize
    est = 4 * tm * n + 4 * n * f_out + 8 * f_out + 2 * tm * f_out * out_bytes
    cost = pl.CostEstimate(
        flops=2 * n * n * f_out, transcendentals=0,
        bytes_accessed=2 * n * n + 2 * n * f_out + 4 * f_out
        + out_bytes * n * f_out)
    return pl.pallas_call(
        functools.partial(_propagate_kernel, relu=relu),
        out_shape=jax.ShapeDtypeStruct((n, f_out), out_dtype),
        grid=(pl.cdiv(n, tm),),
        in_specs=[
            pl.BlockSpec((tm, n), lambda i: (i, 0)),
            pl.BlockSpec((n, f_out), lambda i: (0, 0)),
            pl.BlockSpec((1, f_out), lambda i: (0, 0)),
        ],
        out_specs=pl.BlockSpec((tm, f_out), lambda i: (i, 0)),
        compiler_params=pltpu.CompilerParams(
            dimension_semantics=("parallel",),
            vmem_limit_bytes=_vmem_limit(est)),
        cost_estimate=cost,
    )(adj, hw, b)


def _gcn_layer(adj_bf16, h_bf16, w_bf16, b_f32, *, relu, out_dtype, tm, mxu_n):
    """One GraphConvolution (+ optional ReLU), association chosen by MXU passes."""
    f_in = h_bf16.shape[1]
    f_out = w_bf16.shape[1]
    adj_first = pl.cdiv(f_in, mxu_n) <= pl.cdiv(f_out, mxu_n)
    if adj_first:
        # (adj @ h) @ W fused in one call
        return _fused_layer_call(adj_bf16, h_bf16, w_bf16, b_f32,
                                 relu=relu, out_dtype=out_dtype, tm=tm)
    # adj @ (h @ W): project first (fewer MXU passes when f_in >> f_out)
    hw = _project_call(h_bf16, w_bf16, tm=tm)
    return _propagate_call(adj_bf16, hw, b_f32,
                           relu=relu, out_dtype=out_dtype, tm=tm)


# ---------------------------------------------------------------------------
# Full forward
# ---------------------------------------------------------------------------

def gcn_forward(x, adj, w1, b1, w2, b2, *, dropout=0.0, training=False,
                tm=None, mxu_n=256):
    """GCN.forward (eval mode). x: (N, nfeat), adj: (N, N).

    mxu_n: MXU tile width used by the association heuristic (256 on v6e/v7x,
    128 on v5e).
    """
    del dropout  # identity when training=False (matches F.dropout in eval)
    n, nfeat = x.shape
    nhid = w1.shape[1]
    nout = w2.shape[1]
    nhid_p = _round_up(nhid, _LANE)
    nout_p = _round_up(nout, _LANE)

    # Lane-pad hidden / output feature dims with zero weight & bias columns so
    # the epilogue and output stores are unmasked; pad is sliced off at the end.
    w1p = jnp.zeros((nfeat, nhid_p), jnp.bfloat16).at[:, :nhid].set(
        w1.astype(jnp.bfloat16))
    b1p = jnp.zeros((1, nhid_p), jnp.float32).at[0, :nhid].set(
        b1.astype(jnp.float32))
    w2p = jnp.zeros((nhid_p, nout_p), jnp.bfloat16).at[:nhid, :nout].set(
        w2.astype(jnp.bfloat16))
    b2p = jnp.zeros((1, nout_p), jnp.float32).at[0, :nout].set(
        b2.astype(jnp.float32))

    # bf16 in HBM: half the adj DMA / VMEM footprint; f32 accumulation on MXU.
    adj_bf = adj.astype(jnp.bfloat16)
    x_bf = x.astype(jnp.bfloat16)

    if tm is None:
        tm = min(512, n)  # biggest row tile that comfortably pipelines

    h = _gcn_layer(adj_bf, x_bf, w1p, b1p, relu=True,
                   out_dtype=jnp.bfloat16, tm=tm, mxu_n=mxu_n)
    # TODO(synk): training-mode dropout (pltpu.prng_random_bits mask) not
    # implemented; F.dropout with training=False is the identity.
    if training:
        raise NotImplementedError("training-mode dropout not implemented")
    out = _gcn_layer(adj_bf, h, w2p, b2p, relu=False,
                     out_dtype=jnp.float32, tm=tm, mxu_n=mxu_n)
    return out[:, :nout]


if __name__ == "__main__":
    # Small shapes consistent with the module: N nodes, nfeat -> nhid -> nout.
    N, NFEAT, NHID, NOUT = 256, 64, 32, 8

    key = jax.random.PRNGKey(0)
    key, kx, ka, kw1, kb1, kw2, kb2 = jax.random.split(key, 7)

    x = jax.random.normal(kx, (N, NFEAT), jnp.float32)
    # symmetric, self-loop, row-normalized adjacency (typical GCN preprocessing)
    adj_raw = jax.random.uniform(ka, (N, N), jnp.float32)
    adj = (adj_raw + adj_raw.T) * 0.5 + jnp.eye(N, dtype=jnp.float32)
    adj = adj / jnp.sum(adj, axis=1, keepdims=True)

    # GraphConvolution.reset_parameters: U(-1/sqrt(out_features), 1/sqrt(out_features))
    def uinit(k, shape, fan_out):
        stdv = 1.0 / float(fan_out) ** 0.5
        return jax.random.uniform(k, shape, jnp.float32, -stdv, stdv)

    w1 = uinit(kw1, (NFEAT, NHID), NHID)
    b1 = uinit(kb1, (NHID,), NHID)
    w2 = uinit(kw2, (NHID, NOUT), NOUT)
    b2 = uinit(kb2, (NOUT,), NOUT)

    # tm=128 -> grid of 2 row tiles per layer, exercising the pipelined path.
    out = gcn_forward(x, adj, w1, b1, w2, b2, dropout=0.5, training=False, tm=128)
    out = jax.block_until_ready(out)

    # pure-JAX f32 reference (dropout is identity in eval mode)
    h_ref = jnp.maximum(adj @ (x @ w1) + b1, 0.0)
    out_ref = adj @ (h_ref @ w2) + b2

    assert out.shape == (N, NOUT)
    assert bool(jnp.all(jnp.isfinite(out)))
    assert bool(jnp.allclose(out, out_ref, atol=5e-2, rtol=5e-2))
    print("KERNEL_OK")
</pallas_src>

<mosaic_0001>
module attributes {stable_mosaic.version = 11 : i64} {
  func.func @_fused_layer_kernel(%arg0: i32, %arg1: memref<128x256xbf16, #tpu.memory_space<vmem>>, %arg2: memref<256x64xbf16, #tpu.memory_space<vmem>>, %arg3: memref<64x128xbf16, #tpu.memory_space<vmem>>, %arg4: memref<1x128xf32, #tpu.memory_space<vmem>>, %arg5: memref<128x128xbf16, #tpu.memory_space<vmem>>) attributes {dimension_semantics = [#tpu.dimension_semantics<parallel>], iteration_bounds = array<i64: 2>, scalar_prefetch = 0 : i64, scratch_operands = 0 : i64, tpu.core_type = #tpu.core_type<tc>, window_params = [{transform_indices = @transform_0, window_bounds = array<i64: 128, 256>}, {pipeline_mode = #tpu.pipeline_mode<synchronous>, transform_indices = @transform_1, window_bounds = array<i64: 256, 64>}, {pipeline_mode = #tpu.pipeline_mode<synchronous>, transform_indices = @transform_2, window_bounds = array<i64: 64, 128>}, {pipeline_mode = #tpu.pipeline_mode<synchronous>, transform_indices = @transform_3, window_bounds = array<i64: 1, 128>}, {transform_indices = @transform_4, window_bounds = array<i64: 128, 128>}]} {
    %c0 = arith.constant 0 : index
    %c0_0 = arith.constant 0 : index
    %0 = vector.load %arg1[%c0, %c0_0] : memref<128x256xbf16, #tpu.memory_space<vmem>>, vector<128x256xbf16>
    %c0_1 = arith.constant 0 : index
    %c0_2 = arith.constant 0 : index
    %1 = vector.load %arg2[%c0_1, %c0_2] : memref<256x64xbf16, #tpu.memory_space<vmem>>, vector<256x64xbf16>
    %cst = arith.constant dense<0.000000e+00> : vector<128x64xf32>
    %2 = tpu.matmul %0, %1, %cst {dimension_numbers = #tpu.dot_dimension_numbers<[1], [0], [0], [1], [0, 0, 1, 1], [], []>} : vector<128x256xbf16>, vector<256x64xbf16>, vector<128x64xf32> -> vector<128x64xf32>
    %3 = arith.truncf %2 : vector<128x64xf32> to vector<128x64xbf16>
    %c0_3 = arith.constant 0 : index
    %c0_4 = arith.constant 0 : index
    %4 = vector.load %arg3[%c0_3, %c0_4] : memref<64x128xbf16, #tpu.memory_space<vmem>>, vector<64x128xbf16>
    %cst_5 = arith.constant dense<0.000000e+00> : vector<128x128xf32>
    %5 = tpu.matmul %3, %4, %cst_5 {dimension_numbers = #tpu.dot_dimension_numbers<[1], [0], [0], [1], [0, 0, 1, 1], [], []>} : vector<128x64xbf16>, vector<64x128xbf16>, vector<128x128xf32> -> vector<128x128xf32>
    %c0_6 = arith.constant 0 : index
    %c0_7 = arith.constant 0 : index
    %6 = vector.load %arg4[%c0_6, %c0_7] : memref<1x128xf32, #tpu.memory_space<vmem>>, vector<1x128xf32>
    %7 = vector.broadcast %6 : vector<1x128xf32> to vector<128x128xf32>
    %8 = arith.addf %5, %7 : vector<128x128xf32>
    %cst_8 = arith.constant 0.000000e+00 : f32
    %9 = vector.broadcast %cst_8 : f32 to vector<128x128xf32>
    %10 = arith.maximumf %8, %9 : vector<128x128xf32>
    %11 = arith.truncf %10 : vector<128x128xf32> to vector<128x128xbf16>
    %c0_9 = arith.constant 0 : index
    %c0_10 = arith.constant 0 : index
    %12 = vector.load %arg5[%c0_9, %c0_10] : memref<128x128xbf16, #tpu.memory_space<vmem>>, vector<128x128xbf16>
    tpu.vector_store %arg5[%c0_9, %c0_10], %11 {strides = array<i32>} : memref<128x128xbf16, #tpu.memory_space<vmem>>, vector<128x128xbf16>,
    return
  }
  func.func @transform_0(%arg0: i32) -> (i32, i32) {
    %c0_i32 = arith.constant 0 : i32
    %c0_i32_0 = arith.constant 0 : i32
    return %arg0, %c0_i32 : i32, i32
  }
  func.func @transform_1(%arg0: i32) -> (i32, i32) {
    %c0_i32 = arith.constant 0 : i32
    %c0_i32_0 = arith.constant 0 : i32
    %c0_i32_1 = arith.constant 0 : i32
    return %c0_i32, %c0_i32_0 : i32, i32
  }
  func.func @transform_2(%arg0: i32) -> (i32, i32) {
    %c0_i32 = arith.constant 0 : i32
    %c0_i32_0 = arith.constant 0 : i32
    %c0_i32_1 = arith.constant 0 : i32
    return %c0_i32, %c0_i32_0 : i32, i32
  }
  func.func @transform_3(%arg0: i32) -> (i32, i32) {
    %c0_i32 = arith.constant 0 : i32
    %c0_i32_0 = arith.constant 0 : i32
    %c0_i32_1 = arith.constant 0 : i32
    return %c0_i32, %c0_i32_0 : i32, i32
  }
  func.func @transform_4(%arg0: i32) -> (i32, i32) {
    %c0_i32 = arith.constant 0 : i32
    %c0_i32_0 = arith.constant 0 : i32
    return %arg0, %c0_i32 : i32, i32
  }
}

</mosaic_0001>

<bundles_post_ra>
// kernel: tpu_custom_call.1
= control target key start
LH: loop header
LB: loop body
LE: loop exit
PB: predicated region body
PF: predicated region fallthrough
CT: control target
= control target key end

     0   :  { %9 = vsyncpa [#allocation3], 0  ;;  %s1637_s0 = inlined_call_operand.hbm [shape: bf16[256,256], index: 0, kind: input, shape index: {}]   ;;  %s1638_s1 = inlined_call_operand.vmem [shape: bf16[256,64], index: 1, kind: input, shape index: {}]   ;;  %s1639_s2 = inlined_call_operand.vmem [shape: bf16[64,128], index: 2, kind: input, shape index: {}]   ;;  %s1640_s3 = inlined_call_operand.vmem [shape: f32[1,128], index: 3, kind: input, shape index: {}]   ;;  %s1641_s4 = inlined_call_operand.hbm [shape: bf16[256,128], index: 4, kind: output, shape index: {}]  }
   0x1   :  { %11 = vsyncpa [#allocation3 + $0x1], 0 }
   0x2   :  { %12 = vsyncpa [#allocation4], 0 }
   0x3   :  { %14 = vsyncpa [#allocation4 + $0x1], 0  ;;  %s1374_s15 = smov 0   ;;  %s1376_s16 = smov 0  }
   0x4   :  { %s1378_s17 = smov 0   ;;  %s1380_s18 = smov 0  }
   0x5 LB: > { %s1395_s19 = sadd.s32 4294967295, %s1341_s18   ;;  %s893_s20 = sadd.s32 4294967294, %s1341_s18   ;;  %s1341_s18 = sphi %s1380_s18, %s1654_s18   ;;  %s1337_s17 = sphi %s1378_s17, %s1653_s17   ;;  %s1333_s16 = sphi %s1376_s16, %s1652_s16   ;;  %s1329_s15 = sphi %s1374_s15, %s1651_s15  }
   0x6   : > { %s1399_s21 = sadd.s32 1, %s1341_s18   ;;  %s27_s22 = sadd.s32 1, %s1337_s17 }
   0x7   : > { %s24_s23 = ssub.s32 %s1341_s18, %s1399_s21  ;;  %p34_p0 = scmp.ne.s32.totalorder %s1337_s17, %s1333_s16 }
   0x8   : > { %p25_p1 = scmp.eq.s32.totalorder %s24_s23, 0  ;;  %p35_p2 = scmp.eq.s32.totalorder %s1341_s18, 0 }
   0x9   : > { %p40_p3 = scmp.ne.s32.totalorder %s1333_s16, %s1329_s15  ;;  %p41_p4 = scmp.eq.s32.totalorder %s1395_s19, 0 }
   0xa   : > { %s1411_s24 = scalar_select %p25_p1, %s1337_s17, %s27_s22  }
   0xb   : > { %p1413_p5 = por %p35_p2, %p34_p0  ;;  %p1417_p6 = por %p41_p4, %p40_p3 }
   0xc   : > { %p127_p7 = scmp.eq.s32.totalorder %s1395_s19, 1  ;;  %p133_p8 = scmp.eq.s32.totalorder %s893_s20, 1 }
   0xd   : > { %p1163_p10 = scmp.lt.s32.totalorder %s1341_s18, 2  ;;  %s162_s29 = sand.u32 1, %s1337_s17  }
   0xe   : > { %p1424_p11 = por %p127_p7, %p34_p0  ;;  %p1428_p12 = por %p133_p8, %p40_p3 }
   0xf   : > { %s970_s30 = sshll.u32 %s1341_s18, 11  ;;  %s896_s5 = sshll.u32 %s162_s29, 7 }
  0x10   : > { %s1645_s27 = scalar_select %p1424_p11, 1, 0 }
  0x11   : > { %s1646_s28 = scalar_select %p1428_p12, 1, 0 }
  0x12   : > { %s1437_s8 = scalar_lea.hbm %s1637_s0, %s970_s30  ;;  %s166_s9 = scalar_lea.vmem [#allocation2], %s896_s5 }
  0x13   : > { %s174_s10 = sshll.u32 %s166_s9, 4  ;;  %p1441_p13 = pnand %p1163_p10, %p1413_p5  ;;  %s1445_s10 = int_to_ptr.vmem [resolvable:$true] %s174_s10 }
  0x14   : > { %s1447_s12 = scalar_lea.sflag [#allocation3], %s162_s29  ;;  %s1245_s13 = scalar_lea.hbm %s1437_s8, 2048 }
  0x15   : > { %p1246_p0 = scmp.ne.s32.totalorder %s1437_s8, %s1245_s13  ;;  %p1247_p1 = pneg %p1441_p13 }
  0x16   : > { %s1250_s22 = scalar_lea.hbm %s1637_s0, 4096  ;;  %p1251_p4 = scmp.lt.u32.totalorder %s1437_s8, %s1637_s0 }
  0x17   : > { %p1248_p2 = pnand %p1247_p1, %p1246_p0  ;;  %p1252_p5 = scmp.lt.u32.totalorder %s1250_s22, %s1245_s13 }
  0x18   : > { %p1254_p8 = scmp.lt.u32.totalorder %s1245_s13, %s1437_s8 }
  0x19   : > { %p1249_p3 = pneg %p1248_p2  ;;  %p1253_p7 = por %p1252_p5, %p1251_p4 }
  0x1b   : > { %p1255_p10 = por %p1254_p8, %p1253_p7 }
  0x1d   : > { %p1256_p9 = pnand %p1255_p10, %p1249_p3 }
  0x1f   : > { %1259 = shalt.err (!%p1256_p9)
}
  0x20   : > { %s1260_s29 = scalar_lea.vmem %s1445_s10, 2048  ;;  %s1343_s30 = smov [#allocation2]  }
  0x21   : > { %p1261_p0 = scmp.ne.s32.totalorder %s1445_s10, %s1260_s29  ;;  %s1265_s5 = sshll.u32 %s1343_s30, 4  ;;  %s1266_s5 = int_to_ptr.vmem [resolvable:$false] %s1265_s5 }
  0x22   : > { %s1267_s6 = scalar_lea.vmem %s1266_s5, 4096  ;;  %p1268_p11 = scmp.lt.s32.totalorder %s1445_s10, %s1266_s5 }
  0x23   : > { %p1263_p2 = pnand %p1261_p0, %p1247_p1  ;;  %p1269_p4 = scmp.lt.s32.totalorder %s1267_s6, %s1260_s29 }
  0x25   : > { %p1264_p12 = pneg %p1263_p2  ;;  %p1270_p5 = por %p1269_p4, %p1268_p11 }
  0x27   : > { %p1271_p7 = pnand %p1270_p5, %p1264_p12 }
  0x29   : > { %1274 = shalt.err (!%p1271_p7)
}
  0x2a   : > { %s1344_s7 = smov 128   ;;  %s1345_s9 = smov 8  }
  0x2b   : > { %1158 = dma.hbm_to_vmem [thread:$0]  (!%p1441_p13), %s1437_s8, 2048, %s1445_s10, %s1447_s12, %s1344_s7, %s1344_s7, %s1345_s9  }
  0x2c   : > { %p900_p9 = scmp.ge.s32.totalorder %s1341_s18, 1  ;;  %p182_p1 = scmp.lt.s32.totalorder %s1341_s18, 3 }
  0x2e   : > { %p183_p3 = pnand %p900_p9, %p182_p1 }
  0x2f   : > { %s1478_s13 = sand.u32 (!%p183_p3), 1, %s1333_s16  }
  0x30   : > { %186 = sbr.rel (%p183_p3) target bundleno = 592 (0x250), region = 36  ;;  %s901_s14 = sshll.u32 (!%p183_p3), %s1478_s13, 7 }
  0x31   : > { %s189_s20 = scalar_lea.sflag (!%p183_p3), [#allocation3], %s1478_s13  ;;  %s1482_s22 = scalar_lea.vmem (!%p183_p3), [#allocation2], %s901_s14 }
  0x37   : > { %1320 = dma.done.wait (%p1417_p6), %s189_s20, 2048  }
  0x38   : > { %1322 = vsyncadd (%p1417_p6), %s189_s20, 4294965248  ;;  %v1201_v0 = vld [vmem:[%s1638_s1 + $0x40] sm:$0xff]   ;;  %v1203_v2 = vld [vmem:[%s1638_s1 + $0x48] sm:$0xff]   ;;  %vm588_vm0 = vcmask 523264   ;;  %s902_s7 = sshll.u32 %s1478_s13, 6  ;;  %s987_s20 = sshll.u32 %s1395_s19, 10 }
  0x39   : > { %v1202_v1 = vld [vmem:[%s1638_s1] sm:$0xff]   ;;  %1035 = vmatprep.subr.bf16.mxu0 %v1201_v0  ;;  %1135 = vmatprep.subr.bf16.mxu1 %v1201_v0  ;;  %v1204_v3 = vld [vmem:[%s1638_s1 + $0x8] sm:$0xff]   ;;  %v1205_v4 = vld [vmem:[%s1638_s1 + $0x50] sm:$0xff]   ;;  %s1576_s9 = scalar_lea.vmem [#allocation5], %s902_s7  ;;  %s1591_s11 = scalar_lea.hbm %s1641_s4, %s987_s20 }
  0x3a   : > { %1036 = vmatpush3.bf16.msra.mxu0 %v1202_v1  ;;  %1143 = vmatpush3.bf16.msra.mxu1 %v1202_v1  ;;  %v1206_v5 = vld [vmem:[%s1638_s1 + $0x10] sm:$0xff]   ;;  %v1207_v6 = vld [vmem:[%s1638_s1 + $0x58] sm:$0xff]   ;;  %v1209_v8 = vld [vmem:[%s1638_s1 + $0x60] sm:$0xff]   ;;  %s820_s14 = sshll.u32 %s1576_s9, 4  ;;  %s807_s12 = scalar_lea.sflag [#allocation4], %s1478_s13  ;;  %s1586_s14 = int_to_ptr.vmem [resolvable:$true] %s820_s14 }
  0x3b   : > { %1037 = vmatprep.subr.bf16.mxu0 %v1203_v2  ;;  %1136 = vmatprep.subr.bf16.mxu1 %v1203_v2  ;;  %v1208_v7 = vld [vmem:[%s1638_s1 + $0x18] sm:$0xff]   ;;  %v1210_v9 = vld [vmem:[%s1638_s1 + $0x20] sm:$0xff]   ;;  %v1211_v10 = vld [vmem:[%s1638_s1 + $0x68] sm:$0xff]   ;;  %s1275_s19 = scalar_lea.vmem %s1586_s14, 1024  ;;  %p1648_p11 = scmp.ne.s32.totalorder %s1645_s27, 0 }
  0x3c   : > { %v1219_v11 = vld [vmem:[%s1482_s22 + $0x4] ss:$8 sps:$4 sm:$0xff]   ;;  %v1213_v13 = vld [vmem:[%s1638_s1 + $0x70] sm:$0xff]   ;;  %v1215_v16 = vld [vmem:[%s1638_s1 + $0x78] sm:$0xff]   ;;  %p1276_p6 = scmp.ne.s32.totalorder %s1586_s14, %s1275_s19  ;;  %s1346_s23 = smov [#allocation5]  }
  0x3d   : > { %v1212_v12 = vld [vmem:[%s1638_s1 + $0x28] sm:$0xff]   ;;  %476 = vmatprep.mubr.bf16.mxu0 %v1219_v11  ;;  %v1214_v14 = vld [vmem:[%s1638_s1 + $0x30] sm:$0xff]   ;;  %v1216_v17 = vld [vmem:[%s1638_s1 + $0x38] sm:$0xff]   ;;  %s1279_s25 = sshll.u32 %s1346_s23, 4  ;;  %s1280_s25 = int_to_ptr.vmem [resolvable:$false] %s1279_s25 }
  0x3e   : > { %1038 = vmatpush3.bf16.msra.mxu0 %v1204_v3  ;;  %1144 = vmatpush3.bf16.msra.mxu1 %v1204_v3  ;;  %v1234_v15 = vld [vmem:[%s1482_s22 + $0x64] ss:$8 sps:$4 sm:$0xff]   ;;  %v1217_v18 = vld [vmem:[%s1482_s22] ss:$8 sps:$4 sm:$0xff]   ;;  %v1220_v19 = vld [vmem:[%s1482_s22 + $0x14] ss:$8 sps:$4 sm:$0xff]   ;;  %p1277_p12 = pnand %p1276_p6, %p1648_p11  ;;  %p1282_p8 = scmp.lt.s32.totalorder %s1586_s14, %s1280_s25 }
  0x3f   : > { %1039 = vmatprep.subr.bf16.mxu0 %v1205_v4  ;;  %1137 = vmatprep.subr.bf16.mxu1 %v1205_v4  ;;  %v1232_v20 = vld [vmem:[%s1482_s22 + $0x60] ss:$8 sps:$4 sm:$0xff]   ;;  %v1238_v21 = vld [vmem:[%s1482_s22 + $0x74] ss:$8 sps:$4 sm:$0xff]   ;;  %v1222_v22 = vld [vmem:[%s1482_s22 + $0x10] ss:$8 sps:$4 sm:$0xff]  }
  0x40   : > { %524 = vmatprep.mubr.bf16.mxu1 %v1234_v15  ;;  %v1223_v23 = vld [vmem:[%s1482_s22 + $0x24] ss:$8 sps:$4 sm:$0xff]   ;;  %v1240_v24 = vld [vmem:[%s1482_s22 + $0x70] ss:$8 sps:$4 sm:$0xff]   ;;  %v1225_v25 = vld [vmem:[%s1482_s22 + $0x20] ss:$8 sps:$4 sm:$0xff]   ;;  %p1278_p13 = pneg %p1277_p12 }
  0x41   : > { %v1226_v26 = vld [vmem:[%s1482_s22 + $0x34] ss:$8 sps:$4 sm:$0xff]   ;;  %v1228_v27 = vld [vmem:[%s1482_s22 + $0x30] ss:$8 sps:$4 sm:$0xff]   ;;  %v1229_v28 = vld [vmem:[%s1482_s22 + $0x44] ss:$8 sps:$4 sm:$0xff]  }
  0x42   : > { %1040 = vmatpush3.bf16.msra.mxu0 %v1206_v5  ;;  %1145 = vmatpush3.bf16.msra.mxu1 %v1206_v5  ;;  %v1231_v29 = vld [vmem:[%s1482_s22 + $0x40] ss:$8 sps:$4 sm:$0xff]   ;;  %v1235_v30 = vld [vmem:[%s1482_s22 + $0x54] ss:$8 sps:$4 sm:$0xff]   ;;  %v1237_v31 = vld [vmem:[%s1482_s22 + $0x50] ss:$8 sps:$4 sm:$0xff]  }
  0x43   : > { %1041 = vmatprep.subr.bf16.mxu0 %v1207_v6  ;;  %1138 = vmatprep.subr.bf16.mxu1 %v1207_v6  ;;  %v1241_v32 = vld [vmem:[%s1639_s2] sm:$0xff]   ;;  %v1242_v33 = vld [vmem:[%s1639_s2 + $0x8] sm:$0xff]   ;;  %v1243_v34 = vld [vmem:[%s1639_s2 + $0x10] sm:$0xff]   ;;  %s1281_s29 = scalar_lea.vmem %s1280_s25, 2048 }
  0x44   : > { %v1244_v35 = vld [vmem:[%s1639_s2 + $0x18] sm:$0xff]   ;;  %p1283_p10 = scmp.lt.s32.totalorder %s1281_s29, %s1275_s19 }
  0x46   : > { %1042 = vmatpush3.bf16.msra.mxu0 %v1208_v7  ;;  %1146 = vmatpush3.bf16.msra.mxu1 %v1208_v7  ;;  %p1284_p0 = por %p1283_p10, %p1282_p8 }
  0x47   : > { %1043 = vmatprep.subr.bf16.mxu0 %v1209_v8  ;;  %1139 = vmatprep.subr.bf16.mxu1 %v1209_v8 }
  0x48   : > { %p1285_p2 = pnand %p1284_p0, %p1278_p13 }
  0x4a   : > { %1044 = vmatpush3.bf16.msra.mxu0 %v1210_v9  ;;  %1147 = vmatpush3.bf16.msra.mxu1 %v1210_v9 }
  0x4b   : > { %1045 = vmatprep.subr.bf16.mxu0 %v1211_v10  ;;  %1140 = vmatprep.subr.bf16.mxu1 %v1211_v10 }
  0x4e   : > { %1046 = vmatpush3.bf16.msra.mxu0 %v1212_v12  ;;  %1148 = vmatpush3.bf16.msra.mxu1 %v1212_v12 }
  0x4f   : > { %1047 = vmatprep.subr.bf16.mxu0 %v1213_v13  ;;  %1141 = vmatprep.subr.bf16.mxu1 %v1213_v13 }
  0x52   : > { %1048 = vmatpush3.bf16.msra.mxu0 %v1214_v14  ;;  %1149 = vmatpush3.bf16.msra.mxu1 %v1214_v14 }
  0x53   : > { %1049 = vmatprep.subr.bf16.mxu0 %v1215_v16  ;;  %1142 = vmatprep.subr.bf16.mxu1 %v1215_v16 }
  0x56   : > { %1050 = vmatpush3.bf16.msra.mxu0 %v1216_v17  ;;  %1150 = vmatpush3.bf16.msra.mxu1 %v1216_v17 }
  0x57   : > { %1111 = vmatprep.subr.bf16.mxu1 %v1241_v32 }
  0x59   : > { %477 = vmatmul.mubr.bf16.vlgmr.msra.gmra.mrb[0].mxu0 %v1217_v18  ;;  %525 = vmatmul.mubr.bf16.vlgmr.msra.gmra.mrb[0].mxu1 %v1232_v20 }
  0x5a   : > { %484 = vmatprep.mubr.bf16.mxu0 %v1220_v19  ;;  %532 = vmatprep.mubr.bf16.mxu1 %v1238_v21 }
  0x5b   : > { %1112 = vmatpush3.bf16.msra.mxu1 %v1241_v32 }
  0x5c   : > { %1113 = vmatprep.subr.bf16.mxu1 %v1242_v33 }
  0x5f   : > { %1114 = vmatpush3.bf16.msra.mxu1 %v1242_v33 }
  0x60   : > { %1115 = vmatprep.subr.bf16.mxu1 %v1243_v34 }
  0x61   : > { %485 = vmatmul.mubr.bf16.gmra.mrb[4].mxu0 %v1222_v22  ;;  %533 = vmatmul.mubr.bf16.gmra.mrb[4].mxu1 %v1240_v24 }
  0x62   : > { %492 = vmatprep.mubr.bf16.mxu0 %v1223_v23 }
  0x63   : > { %1116 = vmatpush3.bf16.msra.mxu1 %v1243_v34 }
  0x64   : > { %1117 = vmatprep.subr.bf16.mxu1 %v1244_v35 }
  0x67   : > { %1118 = vmatpush3.bf16.msra.mxu1 %v1244_v35 }
  0x69   : > { %493 = vmatmul.mubr.bf16.gmra.mrb[8].mxu0 %v1225_v25 }
  0x6a   : > { %500 = vmatprep.mubr.bf16.mxu0 %v1226_v26 }
  0x71   : > { %501 = vmatmul.mubr.bf16.gmra.mrb[12].mxu0 %v1228_v27 }
  0x72   : > { %508 = vmatprep.mubr.bf16.mxu0 %v1229_v28  ;;  %v935_v28 = vld [vmem:[%s1640_s3] ss:$0 sm:$0xff] }
  0x79   : > { %509 = vmatmul.mubr.bf16.gmra.mrb[16].mxu0 %v1231_v29 }
  0x7a   : > { %516 = vmatprep.mubr.bf16.mxu0 %v1235_v30 }
  0x81   : > { %517 = vmatmul.mubr.bf16.gmra.mrb[20].mxu0 %v1237_v31 }
 0x12c   : > { %v1051_v36 = vpop.f32.mrb[0].mxu0  ;;  %v1087_v38 = vpop.f32.mrb[0].mxu1 }
 0x12d   : > { %v1052_v37 = vpop.f32.mrb[1].mxu0  ;;  %v1088_v41 = vpop.f32.mrb[1].mxu1 }
 0x12e   : > { %v1053_v39 = vadd.f32 %v1052_v37, %v1051_v36  ;;  %v1054_v40 = vpop.f32.mrb[2].mxu0  ;;  %v1089_v43 = vadd.f32 %v1088_v41, %v1087_v38  ;;  %v1090_v44 = vpop.f32.mrb[2].mxu1 }
 0x12f   : > { %v1055_v42 = vpop.f32.mrb[3].mxu0  ;;  %v1091_v46 = vpop.f32.mrb[3].mxu1 }
 0x130   : > { %v1056_v45 = vadd.f32 %v1055_v42, %v1054_v40  ;;  %v1092_v47 = vadd.f32 %v1091_v46, %v1090_v44 }
 0x132   : > { %v541_v48 = vpack.c.bf16 %v1056_v45, %v1053_v39  ;;  %v547_v49 = vpack.c.bf16 %v1092_v47, %v1089_v43 }
 0x134   : > { %v1057_v50 = vpop.f32.mrb[4].mxu0  ;;  %1119 = vmatprep.mubr.msk.bf16.mxu1 %vm588_vm0, %v541_v48  ;;  %v1093_v52 = vpop.f32.mrb[4].mxu1 }
 0x135   : > { %v1058_v51 = vpop.f32.mrb[5].mxu0  ;;  %v1094_v55 = vpop.f32.mrb[5].mxu1 }
 0x136   : > { %v1059_v53 = vadd.f32 %v1058_v51, %v1057_v50  ;;  %v1060_v54 = vpop.f32.mrb[6].mxu0  ;;  %v1095_v57 = vadd.f32 %v1094_v55, %v1093_v52  ;;  %v1096_v58 = vpop.f32.mrb[6].mxu1 }
 0x137   : > { %v1061_v56 = vpop.f32.mrb[7].mxu0  ;;  %v1097_v60 = vpop.f32.mrb[7].mxu1 }
 0x138   : > { %v1062_v59 = vadd.f32 %v1061_v56, %v1060_v54  ;;  %v1098_v61 = vadd.f32 %v1097_v60, %v1096_v58 }
 0x13a   : > { %v542_v62 = vpack.c.bf16 %v1062_v59, %v1059_v53  ;;  %v548_v63 = vpack.c.bf16 %v1098_v61, %v1095_v57 }
 0x13c   : > { %v1063_v0 = vpop.f32.mrb[8].mxu0  ;;  %1120 = vmatmul.mubr.msk.bf16.vlgmr.msra.gmra.mrb[8].mxu1 %vm588_vm0, %v542_v62 }
 0x13d   : > { %v1064_v1 = vpop.f32.mrb[9].mxu0 }
 0x13e   : > { %v1065_v2 = vadd.f32 %v1064_v1, %v1063_v0  ;;  %v1066_v3 = vpop.f32.mrb[10].mxu0 }
 0x13f   : > { %v1067_v4 = vpop.f32.mrb[11].mxu0 }
 0x140   : > { %v1068_v5 = vadd.f32 %v1067_v4, %v1066_v3 }
 0x142   : > { %v543_v6 = vpack.c.bf16 %v1068_v5, %v1065_v2 }
 0x144   : > { %v1069_v7 = vpop.f32.mrb[12].mxu0  ;;  %1123 = vmatprep.mubr.msk.bf16.mxu1 %vm588_vm0, %v543_v6 }
 0x145   : > { %v1070_v8 = vpop.f32.mrb[13].mxu0 }
 0x146   : > { %v1071_v9 = vadd.f32 %v1070_v8, %v1069_v7  ;;  %v1072_v10 = vpop.f32.mrb[14].mxu0 }
 0x147   : > { %v1073_v11 = vpop.f32.mrb[15].mxu0 }
 0x148   : > { %v1074_v12 = vadd.f32 %v1073_v11, %v1072_v10 }
 0x14a   : > { %v544_v13 = vpack.c.bf16 %v1074_v12, %v1071_v9 }
 0x14c   : > { %v1075_v14 = vpop.f32.mrb[16].mxu0  ;;  %1124 = vmatmul.mubr.msk.bf16.gmra.mrb[12].mxu1 %vm588_vm0, %v544_v13 }
 0x14d   : > { %v1076_v15 = vpop.f32.mrb[17].mxu0 }
 0x14e   : > { %v1077_v16 = vadd.f32 %v1076_v15, %v1075_v14  ;;  %v1078_v17 = vpop.f32.mrb[18].mxu0 }
 0x14f   : > { %v1079_v18 = vpop.f32.mrb[19].mxu0 }
 0x150   : > { %v1080_v19 = vadd.f32 %v1079_v18, %v1078_v17 }
 0x152   : > { %v545_v20 = vpack.c.bf16 %v1080_v19, %v1077_v16 }
 0x154   : > { %v1081_v21 = vpop.f32.mrb[20].mxu0  ;;  %1127 = vmatprep.mubr.msk.bf16.mxu1 %vm588_vm0, %v545_v20 }
 0x155   : > { %v1082_v22 = vpop.f32.mrb[21].mxu0 }
 0x156   : > { %v1083_v23 = vadd.f32 %v1082_v22, %v1081_v21  ;;  %v1084_v24 = vpop.f32.mrb[22].mxu0 }
 0x157   : > { %v1085_v25 = vpop.f32.mrb[23].mxu0 }
 0x158   : > { %v1086_v26 = vadd.f32 %v1085_v25, %v1084_v24 }
 0x15a   : > { %v546_v27 = vpack.c.bf16 %v1086_v26, %v1083_v23 }
 0x15c   : > { %1128 = vmatmul.mubr.msk.bf16.gmra.mrb[16].mxu1 %vm588_vm0, %v546_v27 }
 0x15d   : > { %1131 = vmatprep.mubr.msk.bf16.mxu1 %vm588_vm0, %v547_v49 }
 0x164   : > { %1132 = vmatmul.mubr.msk.bf16.gmra.mrb[20].mxu1 %vm588_vm0, %v548_v63 }
 0x20f   : > { %v1121_v29 = vpop.f32.mrb[8].mxu1 }
 0x210   : > { %v656_v30 = vadd.f32 %v1121_v29, %v935_v28  ;;  %v647_v31 = vpop.f32.mrb[9].mxu1 }
 0x211   : > { %v648_v32 = vadd.f32 %v935_v28, %v647_v31  ;;  %v1122_v33 = vpop.f32.mrb[10].mxu1 }
 0x212   : > { %v659_v34 = vadd.f32 %v1122_v33, %v935_v28  ;;  %v650_v35 = vpop.f32.mrb[11].mxu1  ;;  %v712_v37 = vmax.f32 %v656_v30, 0.0 }
 0x213   : > { %v651_v36 = vadd.f32 %v935_v28, %v650_v35  ;;  %v710_v39 = vmax.f32 %v648_v32, 0.0 }
 0x214   : > { %v713_v38 = vmax.f32 %v659_v34, 0.0 }
 0x215   : > { %v711_v40 = vmax.f32 %v651_v36, 0.0 }
 0x216   : > { %v996_v41 = vpack.c.bf16 %v713_v38, %v712_v37 }
 0x217   : > { %v991_v42 = vpack.c.bf16 %v711_v40, %v710_v39 }
 0x218   : > { %1028 = vst [vmem:[%s1576_s9 + $0x8] sm:$0xff] %v996_v41  }
 0x219   : > { %992 = vst [vmem:[%s1576_s9] sm:$0xff] %v991_v42  }
 0x21f   : > { %v1125_v43 = vpop.f32.mrb[12].mxu1 }
 0x220   : > { %v672_v44 = vadd.f32 %v1125_v43, %v935_v28  ;;  %v663_v45 = vpop.f32.mrb[13].mxu1 }
 0x221   : > { %v664_v46 = vadd.f32 %v935_v28, %v663_v45  ;;  %v1126_v47 = vpop.f32.mrb[14].mxu1 }
 0x222   : > { %v675_v48 = vadd.f32 %v1126_v47, %v935_v28  ;;  %v666_v49 = vpop.f32.mrb[15].mxu1  ;;  %v716_v51 = vmax.f32 %v672_v44, 0.0 }
 0x223   : > { %v667_v50 = vadd.f32 %v935_v28, %v666_v49  ;;  %v714_v53 = vmax.f32 %v664_v46, 0.0 }
 0x224   : > { %v717_v52 = vmax.f32 %v675_v48, 0.0 }
 0x225   : > { %v715_v54 = vmax.f32 %v667_v50, 0.0 }
 0x226   : > { %v1006_v55 = vpack.c.bf16 %v717_v52, %v716_v51 }
 0x227   : > { %v1001_v56 = vpack.c.bf16 %v715_v54, %v714_v53 }
 0x228   : > { %1030 = vst [vmem:[%s1576_s9 + $0x18] sm:$0xff] %v1006_v55  }
 0x229   : > { %1029 = vst [vmem:[%s1576_s9 + $0x10] sm:$0xff] %v1001_v56  }
 0x22f   : > { %v1129_v57 = vpop.f32.mrb[16].mxu1 }
 0x230   : > { %v688_v58 = vadd.f32 %v1129_v57, %v935_v28  ;;  %v679_v59 = vpop.f32.mrb[17].mxu1 }
 0x231   : > { %v680_v60 = vadd.f32 %v935_v28, %v679_v59  ;;  %v1130_v61 = vpop.f32.mrb[18].mxu1 }
 0x232   : > { %v691_v62 = vadd.f32 %v1130_v61, %v935_v28  ;;  %v682_v63 = vpop.f32.mrb[19].mxu1  ;;  %v720_v1 = vmax.f32 %v688_v58, 0.0 }
 0x233   : > { %v683_v0 = vadd.f32 %v935_v28, %v682_v63  ;;  %v718_v3 = vmax.f32 %v680_v60, 0.0 }
 0x234   : > { %v721_v2 = vmax.f32 %v691_v62, 0.0 }
 0x235   : > { %v719_v4 = vmax.f32 %v683_v0, 0.0 }
 0x236   : > { %v1016_v5 = vpack.c.bf16 %v721_v2, %v720_v1 }
 0x237   : > { %v1011_v6 = vpack.c.bf16 %v719_v4, %v718_v3  ;;  %v1133_v7 = vpop.f32.mrb[20].mxu1 }
 0x238   : > { %1032 = vst [vmem:[%s1576_s9 + $0x28] sm:$0xff] %v1016_v5   ;;  %v704_v8 = vadd.f32 %v1133_v7, %v935_v28  ;;  %v695_v9 = vpop.f32.mrb[21].mxu1 }
 0x239   : > { %1031 = vst [vmem:[%s1576_s9 + $0x20] sm:$0xff] %v1011_v6   ;;  %v696_v10 = vadd.f32 %v935_v28, %v695_v9  ;;  %v1134_v11 = vpop.f32.mrb[22].mxu1 }
 0x23a   : > { %v707_v12 = vadd.f32 %v1134_v11, %v935_v28  ;;  %v698_v13 = vpop.f32.mrb[23].mxu1  ;;  %v724_v15 = vmax.f32 %v704_v8, 0.0 }
 0x23b   : > { %v699_v14 = vadd.f32 %v935_v28, %v698_v13  ;;  %v722_v17 = vmax.f32 %v696_v10, 0.0 }
 0x23c   : > { %v725_v16 = vmax.f32 %v707_v12, 0.0 }
 0x23d   : > { %v723_v18 = vmax.f32 %v699_v14, 0.0 }
 0x23e   : > { %v1026_v19 = vpack.c.bf16 %v725_v16, %v724_v15 }
 0x23f   : > { %v1021_v20 = vpack.c.bf16 %v723_v18, %v722_v17 }
 0x240   : > { %1034 = vst [vmem:[%s1576_s9 + $0x38] sm:$0xff] %v1026_v19  }
 0x241   : > { %1033 = vst [vmem:[%s1576_s9 + $0x30] sm:$0xff] %v1021_v20  }
 0x242   : > { %1288 = shalt.err (!%p1285_p2)
}
 0x243   : > { %s1289_s30 = scalar_lea.hbm %s1591_s11, 1024  ;;  %s1293_s5 = scalar_lea.hbm %s1641_s4, 2048 }
 0x244   : > { %p1290_p4 = scmp.ne.s32.totalorder %s1591_s11, %s1289_s30  ;;  %p1294_p9 = scmp.lt.u32.totalorder %s1591_s11, %s1641_s4 }
 0x245   : > { %p1295_p1 = scmp.lt.u32.totalorder %s1293_s5, %s1289_s30  ;;  %p1297_p6 = scmp.lt.u32.totalorder %s1289_s30, %s1591_s11 }
 0x246   : > { %p1291_p5 = pnand %p1290_p4, %p1648_p11 }
 0x247   : > { %p1296_p3 = por %p1295_p1, %p1294_p9 }
 0x248   : > { %p1292_p7 = pneg %p1291_p5 }
 0x249   : > { %p1298_p12 = por %p1297_p6, %p1296_p3 }
 0x24b   : > { %p1299_p13 = pnand %p1298_p12, %p1292_p7 }
 0x24d   : > { %1302 = shalt.err (!%p1299_p13)
}
 0x24e   : > { %s1347_s9 = smov 64   ;;  %s1348_s20 = smov 4  }
 0x24f   : > { %1153 = dma.vmem_to_hbm [thread:$0]  (%p1648_p11), %s1586_s14, 1024, %s1591_s11, %s807_s12, %s1347_s9, %s1347_s9, %s1348_s20  }
 0x250 PF: > { %s835_s8 = sand.u32 1, %s1329_s15   ;;  %p1649_p8 = scmp.ne.s32.totalorder %s1646_s28, 0 }
 0x251   : > { %p1650_p10 = scmp.ge.s32.totalorder %s1341_s18, 2  ;;  %s836_s10 = scalar_lea.sflag [#allocation4], %s835_s8 }
 0x253   : > { %p1160_p0 = pnand %p1650_p10, %p1649_p8 }
 0x255   : > { %1324 = dma.done.wait (!%p1160_p0), %s836_s10, 1024  }
 0x256   : > { %1326 = vsyncadd (!%p1160_p0), %s836_s10, 4294966272  ;;  %p17_p2 = scmp.ge.s32.totalorder %s1399_s21, 4   ;;  %s1651_s15 = smov %s1333_s16 }
 0x257   : > { %s1652_s16 = smov %s1337_s17  ;;  %s1653_s17 = smov %s1411_s24 }
 0x258   : > { %s1654_s18 = smov %s1399_s21  ;;  %19 = sbr.rel (!%p17_p2) target bundleno = 5 (0x5), region = 81 }
 0x25f   :  { %841 = vsyncpa [#allocation3], 1 }
 0x260   :  { %843 = vsyncpa [#allocation3 + $0x1], 1 }
 0x261   :  { %844 = vsyncpa [#allocation4], 1 }
 0x262   :  { %846 = vsyncpa [#allocation4 + $0x1], 1 }

</bundles_post_ra>
